<compile_context>
chip_gen: v5e
topology: v5e:2x2
jax: 0.10.0
libtpu: 0.0.40
codegen_flags: <defaults>
</compile_context>

<pallas_src>
import functools

import jax
import jax.numpy as jnp
from jax.experimental import pallas as pl
from jax.experimental.pallas import tpu as pltpu


# ---------------------------------------------------------------------------
# Fused kernel: conv1 -> relu -> conv2 -> relu -> (+ residual) -> relu
# ---------------------------------------------------------------------------
def _temporal_block_kernel(*refs, ksize, dilation, pad, has_downsample):
    it = iter(refs)
    x_ref = next(it)
    w1_ref = next(it)
    b1_ref = next(it)
    w2_ref = next(it)
    b2_ref = next(it)
    wds_ref = bds_ref = None
    if has_downsample:
        wds_ref = next(it)
        bds_ref = next(it)
    o_ref = next(it)
    x_ext = h1_ext = None
    if pad > 0:
        x_ext = next(it)      # (C_in_p,  pad + TILE_L)  causal halo + current tile
        h1_ext = next(it)     # (C_out_p, pad + TILE_L)

    j = pl.program_id(1)                      # time-tile index (sequential)
    c_out_p, tile_l = o_ref.shape

    x_tile = x_ref[...]                       # (C_in_p, TILE_L), mm_dtype

    # ---- causal halo management (carried across the sequential time axis) ----
    if pad > 0:
        @pl.when(j == 0)
        def _():
            x_ext[:, :pad] = jnp.zeros((x_ext.shape[0], pad), x_ext.dtype)
            h1_ext[:, :pad] = jnp.zeros((h1_ext.shape[0], pad), h1_ext.dtype)

        @pl.when(j > 0)
        def _():
            # Last `pad` timesteps of the previous tile's extended buffers.
            x_ext[:, :pad] = x_ext[:, tile_l:tile_l + pad]
            h1_ext[:, :pad] = h1_ext[:, tile_l:tile_l + pad]

        x_ext[:, pad:] = x_tile

    def stacked(ext_ref, tile_val):
        # Build the (K*C, TILE_L) operand from K dilated shifted windows.
        if pad == 0:                          # => ksize == 1
            return tile_val
        parts = [ext_ref[:, k * dilation:k * dilation + tile_l]
                 for k in range(ksize)]
        return jnp.concatenate(parts, axis=0) if len(parts) > 1 else parts[0]

    # conv1 + bias + ReLU   (dropout1 is identity in eval mode)
    x_stk = stacked(x_ext, x_tile)
    h1 = jnp.maximum(
        jnp.dot(w1_ref[...], x_stk, preferred_element_type=jnp.float32)
        + b1_ref[...], 0.0)                   # (C_out_p, TILE_L) f32

    h1_mm = h1.astype(w2_ref.dtype)
    if pad > 0:
        h1_ext[:, pad:] = h1_mm

    # conv2 + bias + ReLU   (dropout2 is identity in eval mode)
    h1_stk = stacked(h1_ext, h1_mm)
    h2 = jnp.maximum(
        jnp.dot(w2_ref[...], h1_stk, preferred_element_type=jnp.float32)
        + b2_ref[...], 0.0)

    # Residual path fused into the epilogue (+ final ReLU).
    if has_downsample:
        res = jnp.dot(wds_ref[...], x_tile,
                      preferred_element_type=jnp.float32) + bds_ref[...]
    else:
        res = x_tile.astype(jnp.float32)
    o_ref[...] = jnp.maximum(h2 + res, 0.0).astype(o_ref.dtype)


# ---------------------------------------------------------------------------
# Wrapper (pallas_call plumbing)
# ---------------------------------------------------------------------------
def temporal_block_forward(x_ncl, params, *, kernel_size, dilation,
                           max_tile_l=1024, matmul_dtype=None,
                           batch_core_parallel=False):
    """Exact forward semantics of TemporalBlock (eval mode).  x_ncl: (N, C_in, L).

    matmul_dtype=jnp.bfloat16 halves operand/scratch traffic (f32 accumulation kept).
    batch_core_parallel=True shards the batch axis across v7x's two TensorCores.
    """
    n, c_in, l = x_ncl.shape
    c_out = params["w1"].shape[1]
    pad = (kernel_size - 1) * dilation
    has_ds = params.get("w_ds") is not None
    out_dtype = x_ncl.dtype
    mm_dtype = jnp.dtype(out_dtype) if matmul_dtype is None else jnp.dtype(matmul_dtype)

    def rup(v, m):
        return -(-v // m) * m

    # Channel padding to full sublanes (zero rows/cols never change the result).
    c_in_p = rup(c_in, 8)
    c_out_p = rup(c_out, 8)

    # ---- time tiling: always lane-dense (multiple of 128), VMEM-budgeted ----
    itemsize = jnp.dtype(mm_dtype).itemsize
    bytes_per_col = (
        2 * (c_in_p * itemsize + c_out_p * jnp.dtype(out_dtype).itemsize)  # dbl-buf in/out
        + (c_in_p + c_out_p) * itemsize                                    # ext scratch
        + kernel_size * (c_in_p + c_out_p) * itemsize                      # stacked operands
        + 4 * c_out_p * 4)                                                 # f32 temporaries
    budget = 24 * 1024 * 1024          # conservative: fits v7x (64 MiB physical VMEM)
    cap = min(max_tile_l, budget // max(bytes_per_col, 1))
    cap = max(128, (cap // 128) * 128)
    if rup(l, 128) <= cap:
        tile_l = rup(l, 128)
        l_pad = tile_l
    else:
        tile_l = cap
        l_pad = rup(l, tile_l)

    # Right-pad time (causal: later positions never affect kept outputs) + pad channels.
    x_in = x_ncl
    if l_pad != l or c_in_p != c_in:
        x_in = jnp.pad(x_ncl, ((0, 0), (0, c_in_p - c_in), (0, l_pad - l)))
    x_in = x_in.astype(mm_dtype)

    # Stack conv taps:  (K, C_out, C_in) -> (C_out_p, K*C_in_p), tap-major columns,
    # matching the kernel's sublane-concatenated operand ordering.
    def stack_w(w_koi, co_p, ci_p):
        k_, co, ci = w_koi.shape
        wp = jnp.zeros((k_, co_p, ci_p), jnp.float32).at[:, :co, :ci].set(w_koi)
        return jnp.transpose(wp, (1, 0, 2)).reshape(co_p, k_ * ci_p)

    def pad_b(b, co_p):
        return jnp.zeros((co_p, 1), jnp.float32).at[:b.shape[0], :].set(b)

    w1_stk = stack_w(params["w1"], c_out_p, c_in_p).astype(mm_dtype)
    w2_stk = stack_w(params["w2"], c_out_p, c_out_p).astype(mm_dtype)
    b1 = pad_b(params["b1"], c_out_p)
    b2 = pad_b(params["b2"], c_out_p)

    inputs = [x_in, w1_stk, b1, w2_stk, b2]
    in_specs = [
        pl.BlockSpec((pl.Squeezed(), c_in_p, tile_l), lambda i, j: (i, 0, j)),
        pl.BlockSpec((c_out_p, kernel_size * c_in_p), lambda i, j: (0, 0)),
        pl.BlockSpec((c_out_p, 1), lambda i, j: (0, 0)),
        pl.BlockSpec((c_out_p, kernel_size * c_out_p), lambda i, j: (0, 0)),
        pl.BlockSpec((c_out_p, 1), lambda i, j: (0, 0)),
    ]
    if has_ds:
        wds = (jnp.zeros((c_out_p, c_in_p), jnp.float32)
               .at[:c_out, :c_in].set(params["w_ds"]).astype(mm_dtype))
        bds = pad_b(params["b_ds"], c_out_p)
        inputs += [wds, bds]
        in_specs += [
            pl.BlockSpec((c_out_p, c_in_p), lambda i, j: (0, 0)),
            pl.BlockSpec((c_out_p, 1), lambda i, j: (0, 0)),
        ]

    scratch_shapes = []
    if pad > 0:
        scratch_shapes = [
            pltpu.VMEM((c_in_p, pad + tile_l), mm_dtype),    # x halo + current tile
            pltpu.VMEM((c_out_p, pad + tile_l), mm_dtype),   # h1 halo + current tile
        ]

    # Explicit VMEM limit (instead of the default scoped limit), kept v7x-safe.
    weight_bytes = (w1_stk.size + w2_stk.size + c_out_p * c_in_p) * itemsize
    vmem_estimate = bytes_per_col * tile_l + weight_bytes + (1 << 20)
    vmem_limit = int(min(max(2 * vmem_estimate, 32 * 1024 * 1024), 64 * 1024 * 1024))

    if batch_core_parallel:
        # v7x: shard the batch axis across the two TensorCores; the time axis must
        # stay sequential because of the carried causal halo in scratch.
        dim_sem = (pltpu.CORE_PARALLEL, pltpu.ARBITRARY)
    else:
        dim_sem = ("parallel", "arbitrary")

    kernel = functools.partial(
        _temporal_block_kernel,
        ksize=kernel_size, dilation=dilation, pad=pad, has_downsample=has_ds)

    out = pl.pallas_call(
        kernel,
        out_shape=jax.ShapeDtypeStruct((n, c_out_p, l_pad), out_dtype),
        grid=(n, l_pad // tile_l),
        in_specs=in_specs,
        out_specs=pl.BlockSpec((pl.Squeezed(), c_out_p, tile_l),
                               lambda i, j: (i, 0, j)),
        scratch_shapes=scratch_shapes,
        compiler_params=pltpu.CompilerParams(
            dimension_semantics=dim_sem,
            vmem_limit_bytes=vmem_limit),
    )(*inputs)

    return out[:, :c_out, :l]


# ---------------------------------------------------------------------------
# Pure-JAX reference (causal form of the PyTorch module, eval mode)
# ---------------------------------------------------------------------------
def temporal_block_reference(x_ncl, params, *, kernel_size, dilation):
    pad = (kernel_size - 1) * dilation

    def causal_conv(x, w_koi, b):
        n_, _, l_ = x.shape
        xp = jnp.pad(x, ((0, 0), (0, 0), (pad, 0)))
        acc = jnp.zeros((n_, w_koi.shape[1], l_), jnp.float32)
        for k in range(kernel_size):
            acc = acc + jnp.einsum(
                "oc,ncl->nol", w_koi[k],
                xp[:, :, k * dilation:k * dilation + l_])
        return acc + b[None]

    h1 = jax.nn.relu(causal_conv(x_ncl, params["w1"], params["b1"]))
    h2 = jax.nn.relu(causal_conv(h1, params["w2"], params["b2"]))
    if params.get("w_ds") is not None:
        res = jnp.einsum("oc,ncl->nol", params["w_ds"], x_ncl) + params["b_ds"][None]
    else:
        res = x_ncl
    return jax.nn.relu(h2 + res)


# ---------------------------------------------------------------------------
# Deterministic parameter init (mirrors module __init__ / init_weights shapes)
# ---------------------------------------------------------------------------
def init_params(key, n_inputs, n_outputs, kernel_size):
    k1, k2, k3, kb1, kb2, kb3 = jax.random.split(key, 6)

    def wn_weight(k, c_out, c_in, ks):
        # weight_norm (dim=0): w = g * v / ||v||; g initialised to ||v||, so the
        # effective weight equals v ~ N(0, 0.01).  Folded here once.
        v = 0.01 * jax.random.normal(k, (c_out, c_in, ks), jnp.float32)
        norm = jnp.sqrt(jnp.sum(v * v, axis=(1, 2), keepdims=True)) + 1e-12
        w = norm * v / norm
        return jnp.transpose(w, (2, 0, 1))      # kernel-friendly (K, C_out, C_in)

    params = {
        "w1": wn_weight(k1, n_outputs, n_inputs, kernel_size),
        "b1": 0.01 * jax.random.normal(kb1, (n_outputs, 1), jnp.float32),
        "w2": wn_weight(k2, n_outputs, n_outputs, kernel_size),
        "b2": 0.01 * jax.random.normal(kb2, (n_outputs, 1), jnp.float32),
    }
    if n_inputs != n_outputs:
        w_ds = 0.01 * jax.random.normal(k3, (n_outputs, n_inputs, 1), jnp.float32)
        params["w_ds"] = w_ds[:, :, 0]                                  # (C_out, C_in)
        params["b_ds"] = 0.01 * jax.random.normal(kb3, (n_outputs, 1), jnp.float32)
    else:
        params["w_ds"] = None
        params["b_ds"] = None
    return params


if __name__ == "__main__":
    key = jax.random.PRNGKey(0)
    kx, kp, kp2, kx2 = jax.random.split(key, 4)

    # TODO(synk): nn.Dropout is a training-time stochastic op; modeled as identity (eval).

    N, C_IN, C_OUT, L = 2, 4, 8, 16
    KERNEL_SIZE, DILATION = 3, 2

    x = jax.random.normal(kx, (N, C_IN, L), jnp.float32)   # PyTorch NCL layout

    # Case 1: n_inputs != n_outputs  (1x1 downsample residual path), single time tile.
    params = init_params(kp, C_IN, C_OUT, KERNEL_SIZE)
    out = temporal_block_forward(x, params, kernel_size=KERNEL_SIZE, dilation=DILATION)
    out = jax.block_until_ready(out)
    ref = temporal_block_reference(x, params, kernel_size=KERNEL_SIZE, dilation=DILATION)
    assert out.shape == (N, C_OUT, L), out.shape
    assert bool(jnp.all(out >= 0.0))                        # final ReLU
    assert bool(jnp.allclose(out, ref, atol=1e-5, rtol=1e-5)), \
        float(jnp.max(jnp.abs(out - ref)))

    # Case 2: n_inputs == n_outputs  (identity residual path, padded channels).
    params_id = init_params(kp2, C_IN, C_IN, KERNEL_SIZE)
    out_id = temporal_block_forward(x, params_id, kernel_size=KERNEL_SIZE,
                                    dilation=DILATION)
    out_id = jax.block_until_ready(out_id)
    ref_id = temporal_block_reference(x, params_id, kernel_size=KERNEL_SIZE,
                                      dilation=DILATION)
    assert out_id.shape == (N, C_IN, L), out_id.shape
    assert bool(jnp.allclose(out_id, ref_id, atol=1e-5, rtol=1e-5)), \
        float(jnp.max(jnp.abs(out_id - ref_id)))

    # Case 3: multi-tile time axis (exercises the carried causal halo across tiles).
    L2, DIL2 = 384, 4
    x2 = jax.random.normal(kx2, (N, C_IN, L2), jnp.float32)
    out_mt = temporal_block_forward(x2, params, kernel_size=KERNEL_SIZE,
                                    dilation=DIL2, max_tile_l=128)
    out_mt = jax.block_until_ready(out_mt)
    ref_mt = temporal_block_reference(x2, params, kernel_size=KERNEL_SIZE,
                                      dilation=DIL2)
    assert out_mt.shape == (N, C_OUT, L2), out_mt.shape
    assert bool(jnp.allclose(out_mt, ref_mt, atol=1e-5, rtol=1e-5)), \
        float(jnp.max(jnp.abs(out_mt - ref_mt)))

    print("KERNEL_OK")
</pallas_src>

<mosaic_0001>
module attributes {stable_mosaic.version = 11 : i64} {
  func.func @_temporal_block_kernel(%arg0: i32, %arg1: i32, %arg2: memref<1x8x128xf32, #tpu.memory_space<vmem>>, %arg3: memref<8x24xf32, #tpu.memory_space<vmem>>, %arg4: memref<8x1xf32, #tpu.memory_space<vmem>>, %arg5: memref<8x24xf32, #tpu.memory_space<vmem>>, %arg6: memref<8x1xf32, #tpu.memory_space<vmem>>, %arg7: memref<8x8xf32, #tpu.memory_space<vmem>>, %arg8: memref<8x1xf32, #tpu.memory_space<vmem>>, %arg9: memref<1x8x128xf32, #tpu.memory_space<vmem>>, %arg10: memref<8x132xf32, #tpu.memory_space<vmem>>, %arg11: memref<8x132xf32, #tpu.memory_space<vmem>>) attributes {dimension_semantics = [#tpu.dimension_semantics<parallel>, #tpu.dimension_semantics<arbitrary>], iteration_bounds = array<i64: 2, 1>, scalar_prefetch = 0 : i64, scratch_operands = 2 : i64, tpu.core_type = #tpu.core_type<tc>, window_params = [{transform_indices = @transform_0, window_bounds = array<i64: 1, 8, 128>}, {pipeline_mode = #tpu.pipeline_mode<synchronous>, transform_indices = @transform_1, window_bounds = array<i64: 8, 24>}, {pipeline_mode = #tpu.pipeline_mode<synchronous>, transform_indices = @transform_2, window_bounds = array<i64: 8, 1>}, {pipeline_mode = #tpu.pipeline_mode<synchronous>, transform_indices = @transform_3, window_bounds = array<i64: 8, 24>}, {pipeline_mode = #tpu.pipeline_mode<synchronous>, transform_indices = @transform_4, window_bounds = array<i64: 8, 1>}, {pipeline_mode = #tpu.pipeline_mode<synchronous>, transform_indices = @transform_5, window_bounds = array<i64: 8, 8>}, {pipeline_mode = #tpu.pipeline_mode<synchronous>, transform_indices = @transform_6, window_bounds = array<i64: 8, 1>}, {transform_indices = @transform_7, window_bounds = array<i64: 1, 8, 128>}]} {
    %c0 = arith.constant 0 : index
    %c0_0 = arith.constant 0 : index
    %c0_1 = arith.constant 0 : index
    %0 = vector.load %arg2[%c0, %c0_0, %c0_1] : memref<1x8x128xf32, #tpu.memory_space<vmem>>, vector<1x8x128xf32>
    %1 = vector.shape_cast %0 : vector<1x8x128xf32> to vector<8x128xf32>
    %c0_i32 = arith.constant 0 : i32
    %2 = arith.cmpi eq, %arg1, %c0_i32 : i32
    %3 = arith.extui %2 : i1 to i32
    %c0_i32_2 = arith.constant 0 : i32
    %4 = arith.cmpi ne, %3, %c0_i32_2 : i32
    scf.if %4 {
      %cst_39 = arith.constant 0.000000e+00 : f32
      %43 = vector.broadcast %cst_39 : f32 to vector<8x4xf32>
      %c0_40 = arith.constant 0 : index
      %c0_41 = arith.constant 0 : index
      %44 = vector.load %arg10[%c0_40, %c0_41] : memref<8x132xf32, #tpu.memory_space<vmem>>, vector<8x4xf32>
      tpu.vector_store %arg10[%c0_40, %c0_41], %43 {strides = array<i32>} : memref<8x132xf32, #tpu.memory_space<vmem>>, vector<8x4xf32>,
      %cst_42 = arith.constant 0.000000e+00 : f32
      %45 = vector.broadcast %cst_42 : f32 to vector<8x4xf32>
      %c0_43 = arith.constant 0 : index
      %c0_44 = arith.constant 0 : index
      %46 = vector.load %arg11[%c0_43, %c0_44] : memref<8x132xf32, #tpu.memory_space<vmem>>, vector<8x4xf32>
      tpu.vector_store %arg11[%c0_43, %c0_44], %45 {strides = array<i32>} : memref<8x132xf32, #tpu.memory_space<vmem>>, vector<8x4xf32>,
    } else {
    }
    %c0_i32_3 = arith.constant 0 : i32
    %5 = arith.cmpi sgt, %arg1, %c0_i32_3 : i32
    %6 = arith.extui %5 : i1 to i32
    %c0_i32_4 = arith.constant 0 : i32
    %7 = arith.cmpi ne, %6, %c0_i32_4 : i32
    scf.if %7 {
      %c0_39 = arith.constant 0 : index
      %c128 = arith.constant 128 : index
      %43 = vector.load %arg10[%c0_39, %c128] : memref<8x132xf32, #tpu.memory_space<vmem>>, vector<8x4xf32>
      %c0_40 = arith.constant 0 : index
      %c0_41 = arith.constant 0 : index
      %44 = vector.load %arg10[%c0_40, %c0_41] : memref<8x132xf32, #tpu.memory_space<vmem>>, vector<8x4xf32>
      tpu.vector_store %arg10[%c0_40, %c0_41], %43 {strides = array<i32>} : memref<8x132xf32, #tpu.memory_space<vmem>>, vector<8x4xf32>,
      %c0_42 = arith.constant 0 : index
      %c128_43 = arith.constant 128 : index
      %45 = vector.load %arg11[%c0_42, %c128_43] : memref<8x132xf32, #tpu.memory_space<vmem>>, vector<8x4xf32>
      %c0_44 = arith.constant 0 : index
      %c0_45 = arith.constant 0 : index
      %46 = vector.load %arg11[%c0_44, %c0_45] : memref<8x132xf32, #tpu.memory_space<vmem>>, vector<8x4xf32>
      tpu.vector_store %arg11[%c0_44, %c0_45], %45 {strides = array<i32>} : memref<8x132xf32, #tpu.memory_space<vmem>>, vector<8x4xf32>,
    } else {
    }
    %c0_5 = arith.constant 0 : index
    %c4 = arith.constant 4 : index
    %8 = vector.load %arg10[%c0_5, %c4] : memref<8x132xf32, #tpu.memory_space<vmem>>, vector<8x128xf32>
    tpu.vector_store %arg10[%c0_5, %c4], %1 {strides = array<i32>} : memref<8x132xf32, #tpu.memory_space<vmem>>, vector<8x128xf32>,
    %c0_6 = arith.constant 0 : index
    %c0_7 = arith.constant 0 : index
    %9 = vector.load %arg10[%c0_6, %c0_7] : memref<8x132xf32, #tpu.memory_space<vmem>>, vector<8x128xf32>
    %c0_8 = arith.constant 0 : index
    %c2 = arith.constant 2 : index
    %10 = vector.load %arg10[%c0_8, %c2] : memref<8x132xf32, #tpu.memory_space<vmem>>, vector<8x128xf32>
    %c0_9 = arith.constant 0 : index
    %c4_10 = arith.constant 4 : index
    %11 = vector.load %arg10[%c0_9, %c4_10] : memref<8x132xf32, #tpu.memory_space<vmem>>, vector<8x128xf32>
    %12 = tpu.concatenate %9, %10, %11 in 0 : vector<8x128xf32>, vector<8x128xf32>, vector<8x128xf32> -> vector<24x128xf32>
    %c0_11 = arith.constant 0 : index
    %c0_12 = arith.constant 0 : index
    %13 = vector.load %arg3[%c0_11, %c0_12] : memref<8x24xf32, #tpu.memory_space<vmem>>, vector<8x24xf32>
    %cst = arith.constant dense<0.000000e+00> : vector<8x128xf32>
    %14 = tpu.matmul %13, %12, %cst {dimension_numbers = #tpu.dot_dimension_numbers<[1], [0], [0], [1], [0, 0, 1, 1], [], []>} : vector<8x24xf32>, vector<24x128xf32>, vector<8x128xf32> -> vector<8x128xf32>
    %c0_13 = arith.constant 0 : index
    %c0_14 = arith.constant 0 : index
    %15 = vector.load %arg4[%c0_13, %c0_14] : memref<8x1xf32, #tpu.memory_space<vmem>>, vector<8x1xf32>
    %16 = vector.broadcast %15 : vector<8x1xf32> to vector<8x128xf32>
    %17 = arith.addf %14, %16 : vector<8x128xf32>
    %cst_15 = arith.constant 0.000000e+00 : f32
    %18 = vector.broadcast %cst_15 : f32 to vector<8x128xf32>
    %19 = arith.maximumf %17, %18 : vector<8x128xf32>
    %c0_16 = arith.constant 0 : index
    %c4_17 = arith.constant 4 : index
    %20 = vector.load %arg11[%c0_16, %c4_17] : memref<8x132xf32, #tpu.memory_space<vmem>>, vector<8x128xf32>
    tpu.vector_store %arg11[%c0_16, %c4_17], %19 {strides = array<i32>} : memref<8x132xf32, #tpu.memory_space<vmem>>, vector<8x128xf32>,
    %c0_18 = arith.constant 0 : index
    %c0_19 = arith.constant 0 : index
    %21 = vector.load %arg11[%c0_18, %c0_19] : memref<8x132xf32, #tpu.memory_space<vmem>>, vector<8x128xf32>
    %c0_20 = arith.constant 0 : index
    %c2_21 = arith.constant 2 : index
    %22 = vector.load %arg11[%c0_20, %c2_21] : memref<8x132xf32, #tpu.memory_space<vmem>>, vector<8x128xf32>
    %c0_22 = arith.constant 0 : index
    %c4_23 = arith.constant 4 : index
    %23 = vector.load %arg11[%c0_22, %c4_23] : memref<8x132xf32, #tpu.memory_space<vmem>>, vector<8x128xf32>
    %24 = tpu.concatenate %21, %22, %23 in 0 : vector<8x128xf32>, vector<8x128xf32>, vector<8x128xf32> -> vector<24x128xf32>
    %c0_24 = arith.constant 0 : index
    %c0_25 = arith.constant 0 : index
    %25 = vector.load %arg5[%c0_24, %c0_25] : memref<8x24xf32, #tpu.memory_space<vmem>>, vector<8x24xf32>
    %cst_26 = arith.constant dense<0.000000e+00> : vector<8x128xf32>
    %26 = tpu.matmul %25, %24, %cst_26 {dimension_numbers = #tpu.dot_dimension_numbers<[1], [0], [0], [1], [0, 0, 1, 1], [], []>} : vector<8x24xf32>, vector<24x128xf32>, vector<8x128xf32> -> vector<8x128xf32>
    %c0_27 = arith.constant 0 : index
    %c0_28 = arith.constant 0 : index
    %27 = vector.load %arg6[%c0_27, %c0_28] : memref<8x1xf32, #tpu.memory_space<vmem>>, vector<8x1xf32>
    %28 = vector.broadcast %27 : vector<8x1xf32> to vector<8x128xf32>
    %29 = arith.addf %26, %28 : vector<8x128xf32>
    %cst_29 = arith.constant 0.000000e+00 : f32
    %30 = vector.broadcast %cst_29 : f32 to vector<8x128xf32>
    %31 = arith.maximumf %29, %30 : vector<8x128xf32>
    %c0_30 = arith.constant 0 : index
    %c0_31 = arith.constant 0 : index
    %32 = vector.load %arg7[%c0_30, %c0_31] : memref<8x8xf32, #tpu.memory_space<vmem>>, vector<8x8xf32>
    %cst_32 = arith.constant dense<0.000000e+00> : vector<8x128xf32>
    %33 = tpu.matmul %32, %1, %cst_32 {dimension_numbers = #tpu.dot_dimension_numbers<[1], [0], [0], [1], [0, 0, 1, 1], [], []>} : vector<8x8xf32>, vector<8x128xf32>, vector<8x128xf32> -> vector<8x128xf32>
    %c0_33 = arith.constant 0 : index
    %c0_34 = arith.constant 0 : index
    %34 = vector.load %arg8[%c0_33, %c0_34] : memref<8x1xf32, #tpu.memory_space<vmem>>, vector<8x1xf32>
    %35 = vector.broadcast %34 : vector<8x1xf32> to vector<8x128xf32>
    %36 = arith.addf %33, %35 : vector<8x128xf32>
    %37 = arith.addf %31, %36 : vector<8x128xf32>
    %cst_35 = arith.constant 0.000000e+00 : f32
    %38 = vector.broadcast %cst_35 : f32 to vector<8x128xf32>
    %39 = arith.maximumf %37, %38 : vector<8x128xf32>
    %c0_36 = arith.constant 0 : index
    %c0_37 = arith.constant 0 : index
    %c0_38 = arith.constant 0 : index
    %40 = vector.load %arg9[%c0_36, %c0_37, %c0_38] : memref<1x8x128xf32, #tpu.memory_space<vmem>>, vector<1x8x128xf32>
    %41 = vector.shape_cast %40 : vector<1x8x128xf32> to vector<8x128xf32>
    %42 = vector.shape_cast %39 : vector<8x128xf32> to vector<1x8x128xf32>
    tpu.vector_store %arg9[%c0_36, %c0_37, %c0_38], %42 {strides = array<i32>} : memref<1x8x128xf32, #tpu.memory_space<vmem>>, vector<1x8x128xf32>,
    return
  }
  func.func @transform_0(%arg0: i32, %arg1: i32) -> (i32, i32, i32) {
    %c0_i32 = arith.constant 0 : i32
    %c0_i32_0 = arith.constant 0 : i32
    return %arg0, %c0_i32, %arg1 : i32, i32, i32
  }
  func.func @transform_1(%arg0: i32, %arg1: i32) -> (i32, i32) {
    %c0_i32 = arith.constant 0 : i32
    %c0_i32_0 = arith.constant 0 : i32
    %c0_i32_1 = arith.constant 0 : i32
    return %c0_i32, %c0_i32_0 : i32, i32
  }
  func.func @transform_2(%arg0: i32, %arg1: i32) -> (i32, i32) {
    %c0_i32 = arith.constant 0 : i32
    %c0_i32_0 = arith.constant 0 : i32
    %c0_i32_1 = arith.constant 0 : i32
    return %c0_i32, %c0_i32_0 : i32, i32
  }
  func.func @transform_3(%arg0: i32, %arg1: i32) -> (i32, i32) {
    %c0_i32 = arith.constant 0 : i32
    %c0_i32_0 = arith.constant 0 : i32
    %c0_i32_1 = arith.constant 0 : i32
    return %c0_i32, %c0_i32_0 : i32, i32
  }
  func.func @transform_4(%arg0: i32, %arg1: i32) -> (i32, i32) {
    %c0_i32 = arith.constant 0 : i32
    %c0_i32_0 = arith.constant 0 : i32
    %c0_i32_1 = arith.constant 0 : i32
    return %c0_i32, %c0_i32_0 : i32, i32
  }
  func.func @transform_5(%arg0: i32, %arg1: i32) -> (i32, i32) {
    %c0_i32 = arith.constant 0 : i32
    %c0_i32_0 = arith.constant 0 : i32
    %c0_i32_1 = arith.constant 0 : i32
    return %c0_i32, %c0_i32_0 : i32, i32
  }
  func.func @transform_6(%arg0: i32, %arg1: i32) -> (i32, i32) {
    %c0_i32 = arith.constant 0 : i32
    %c0_i32_0 = arith.constant 0 : i32
    %c0_i32_1 = arith.constant 0 : i32
    return %c0_i32, %c0_i32_0 : i32, i32
  }
  func.func @transform_7(%arg0: i32, %arg1: i32) -> (i32, i32, i32) {
    %c0_i32 = arith.constant 0 : i32
    %c0_i32_0 = arith.constant 0 : i32
    return %arg0, %c0_i32, %arg1 : i32, i32, i32
  }
}

</mosaic_0001>

<bundles_post_ra>
// kernel: tpu_custom_call.1
= control target key start
LH: loop header
LB: loop body
LE: loop exit
PB: predicated region body
PF: predicated region fallthrough
CT: control target
= control target key end

     0   :  { %12 = vsyncpa [#allocation5], 0  ;;  %s1073_s0 = inlined_call_operand.vmem [shape: f32[2,8,128], index: 0, kind: input, shape index: {}]   ;;  %s1074_s1 = inlined_call_operand.vmem [shape: f32[8,24], index: 1, kind: input, shape index: {}]   ;;  %s1075_s2 = inlined_call_operand.vmem [shape: f32[8,1], index: 2, kind: input, shape index: {}]   ;;  %s1076_s3 = inlined_call_operand.hbm [shape: f32[8,24], index: 3, kind: input, shape index: {}]   ;;  %s1077_s4 = inlined_call_operand.vmem [shape: f32[8,1], index: 4, kind: input, shape index: {}]   ;;  %s1078_s5 = inlined_call_operand.hbm [shape: f32[8,8], index: 5, kind: input, shape index: {}]   ;;  %s1079_s6 = inlined_call_operand.vmem [shape: f32[8,1], index: 6, kind: input, shape index: {}]   ;;  %s1080_s7 = inlined_call_operand.hbm [shape: f32[2,8,128], index: 7, kind: output, shape index: {}]  }
   0x1   :  { %13 = vsyncpa [#allocation8], 0 }
   0x2   :  { %14 = vsyncpa [#allocation6], 0 }
   0x3   :  { %16 = vsyncpa [#allocation6 + $0x1], 0  ;;  %s918_s24 = smov 0   ;;  %s920_s25 = smov 0  }
   0x4   :  { %s922_s26 = smov 0   ;;  %s924_s27 = smov 0  }
   0x5   :  { %s926_s28 = smov 0   ;;  %s928_s29 = smov 0  }
   0x6 LB: > { %s601_s30 = sadd.s32 4294967295, %s869_s29   ;;  %s602_s8 = sadd.s32 4294967294, %s869_s29   ;;  %s869_s29 = sphi %s928_s29, %s22_s29   ;;  %s865_s28 = sphi %s926_s28, %s1089_s28   ;;  %s861_s27 = sphi %s924_s27, %s1088_s27   ;;  %s857_s26 = sphi %s922_s26, %s1087_s26   ;;  %s853_s25 = sphi %s920_s25, %s1086_s25   ;;  %s849_s24 = sphi %s918_s24, %s1085_s24  }
   0x7   : > { %s34_s9 = sadd.s32 1, %s865_s28  ;;  %s197_s10 = sadd.s32 1, %s857_s26 }
   0x8   : > { %p36_p0 = scmp.ge.s32.totalorder %s34_s9, 2  ;;  %p207_p1 = scmp.ne.s32.totalorder %s857_s26, %s853_s25 }
   0x9   : > { %p208_p2 = scmp.eq.s32.totalorder %s601_s30, 1  ;;  %p213_p3 = scmp.ne.s32.totalorder %s853_s25, %s849_s24 }
   0xa   : > { %s1091_s9 = smov (%p36_p0, %s34_s9), 0  ;;  %p214_p5 = scmp.eq.s32.totalorder %s602_s8, 1 }
   0xb   : > { %p958_p4 = por %p208_p2, %p207_p1  ;;  %s192_s12 = ssub.s32 %s865_s28, %s1091_s9 }
   0xc   : > { %p603_p6 = scmp.ge.s32.totalorder %s869_s29, 1  ;;  %p195_p7 = scmp.eq.s32.totalorder %s192_s12, 0 }
   0xd   : > { %p965_p8 = por %p214_p5, %p213_p3  ;;  %p221_p9 = scmp.lt.s32.totalorder %s869_s29, 3 }
   0xe   : > { %s971_s14 = scalar_select %p195_p7, %s857_s26, %s197_s10  }
   0xf   : > { %p973_p10 = pnand %p603_p6, %p221_p9  ;;  %p977_p11 = scmp.eq.s32.totalorder %s601_s30, 0 }
  0x10   : > { %s239_s19 = sshll.u32 %s1076_s3, 4  ;;  %s871_s20 = smov [#allocation4]   ;;  %s240_s19 = int_to_ptr.hbm [resolvable:$true] %s239_s19 }
  0x11   : > { %p629_p12 = pneg %p973_p10  ;;  %s241_s21 = sshll.u32 %s871_s20, 4  ;;  %s242_s21 = int_to_ptr.vmem [resolvable:$true] %s241_s21 }
  0x12   : > { %s254_s8 = sshll.u32 %s1078_s5, 4  ;;  %s872_s30 = smov [#allocation7]   ;;  %s255_s8 = int_to_ptr.hbm [resolvable:$true] %s254_s8 }
  0x13   : > { %p630_p13 = pnand %p977_p11, %p629_p12  ;;  %s256_s10 = sshll.u32 %s872_s30, 4  ;;  %s257_s10 = int_to_ptr.vmem [resolvable:$true] %s256_s10 }
  0x14   : > { %282 = sbr.rel (%p973_p10) target bundleno = 774 (0x306), region = 48 }
  0x15   : > { %632 = dma.hbm_to_vmem [thread:$0]  (!%p630_p13), %s240_s19, 128, %s242_s21, [#allocation5]  }
  0x16   : > { %635 = dma.hbm_to_vmem [thread:$0]  (!%p630_p13), %s255_s8, 128, %s257_s10, [#allocation8]  }
  0x19   : > { %836 = dma.done.wait (%p977_p11), [#allocation5], 128  }
  0x1a   : > { %838 = vsyncadd (%p977_p11), [#allocation5], 4294967168 }
  0x1b   : > { %840 = dma.done.wait (%p977_p11), [#allocation8], 128  }
  0x1c   : > { %842 = vsyncadd (%p977_p11), [#allocation8], 4294967168  ;;  %p322_p0 = scmp.lt.s32.totalorder %s861_s27, 1  ;;  %vm334_vm0 = vcmask 31744   ;;  %v873_v0 = vmov 0.0   ;;  %s874_s20 = smov 4  }
  0x1d   : > { %335 = vst.msk [vmem:[#allocation2] sm:$0xff] %vm334_vm0, %v873_v0  ;;  %vm350_vm1 = vcmask 1047584   ;;  %s875_s16 = smov 126   ;;  %s876_s21 = smov 124   ;;  %v373_v6 = vld [vmem:[%s1075_s2] sm:$0xff]  ;;  %v877_v7 = vmov 0  }
  0x1e   : > { %s323_s12 = scalar_select %p322_p0, %s861_s27, 1  ;;  %336 = vst.msk [vmem:[#allocation3] sm:$0xff] %vm334_vm0, %v873_v0  ;;  %710 = vset.pattern.permute.xlu1 %v877_v7  ;;  %721 = vset.pattern.permute.xlu2 %v877_v7  ;;  %v427_v8 = vld [vmem:[%s1077_s4] sm:$0xff]  ;;  %vm369_vm2 = vcmask 1014784   ;;  %vm362_vm3 = vcmask 1031168   ;;  %vm379_vm4 = vcmask 195584  }
  0x1f   : > { %722 = vset.pattern.permute.xlu0 %v877_v7  ;;  %v372_v17 = vld [vmem:[%s1074_s1] sm:$0xff]  ;;  %v457_v26 = vld [vmem:[#allocation7] sm:$0xff]  ;;  %vm464_vm5 = vcmask 64512   ;;  %s319_s18 = sand.u32 1, %s853_s25  }
  0x20   : > { %s611_s15 = sshll.u32 %s323_s12, 3  ;;  %v458_v27 = vld [vmem:[%s1079_s6] sm:$0xff]  ;;  %s492_s10 = scalar_lea.sflag [#allocation6], %s319_s18 }
  0x21   : > { %s328_s19 = scalar_lea.vmem %s1073_s0, %s611_s15  ;;  %v426_v36 = vld [vmem:[#allocation4] sm:$0xff] }
  0x22   : > { %v329_v1 = vld [vmem:[%s328_s19] sm:$0xff]  ;;  %s610_s19 = sshll.u32 %s319_s18, 3 }
  0x23   : > { %347 = vrot.lane.b32.xlu0 %v329_v1, %s874_s20  ;;  %483 = vmatpush.msra.mxu2 %v329_v1  ;;  %s321_s23 = scalar_lea.vmem [#allocation9], %s610_s19 }
  0x24   : > { %614 = vmatmul.msk.f32.vlgmr.msra.gmra.mxu2 %vm464_vm5, %v457_v26  ;;  %s505_s8 = sshll.u32 %s321_s23, 4  ;;  %s506_s8 = int_to_ptr.vmem [resolvable:$true] %s505_s8 }
  0x95   : > { %v348_v2 = vpop.permute.xlu0 %347 }
  0x96   : > { %351 = vst.msk [vmem:[#allocation2] sm:$0xff] %vm350_vm1, %v348_v2 }
  0x97   : > { %353 = vst.msk [vmem:[#allocation2 + $0x8] sm:$0xff] %vm334_vm0, %v348_v2 }
  0x9d   : > { %v354_v3 = vld [vmem:[#allocation2] sm:$0xff] }
  0x9e   : > { %v355_v4 = vld [vmem:[#allocation2 + $0x8] sm:$0xff] }
  0x9f   : > { %v705_v5 = vpack.i.bf16 %v355_v4, %v354_v3 }
  0xa1   : > { %706 = vrot.lane.b32.xlu1 %v705_v5, %s875_s16  ;;  %701 = vrot.lane.b32.xlu0 %v705_v5, %s876_s21 }
  0xa7   : > { %v485_v38 = vpop.f32.mrf.mxu2 }
  0xa9   : > { %376 = vperm.xlu1 %710, %v373_v6  }
  0xb1   : > { %430 = vperm.xlu1 %710, %v427_v8  }
 0x113   : > { %v707_v9 = vpop.permute.xlu1 %706  ;;  %v702_v10 = vpop.permute.xlu0 %701 }
 0x114   : > { %v709_v11 = vunpack.i.h.bf16 %v707_v9  ;;  %v708_v12 = vunpack.i.l.bf16 %v707_v9  ;;  %v704_v13 = vunpack.i.h.bf16 %v702_v10  ;;  %v703_v14 = vunpack.i.l.bf16 %v702_v10 }
 0x116   : > { %v370_v15 = vsel %vm369_vm2, %v703_v14, %v704_v13  ;;  %v363_v16 = vsel %vm362_vm3, %v708_v12, %v709_v11 }
 0x117   : > { %396 = vmatpush.msra.mxu0 %v370_v15 }
 0x119   : > { %397 = vmatpush.msra.mxu0 %v363_v16 }
 0x11b   : > { %398 = vmatpush.msra.mxu0 %v354_v3  ;;  %v377_v18 = vpop.permute.xlu1 %376 }
 0x11c   : > { %612 = vmatmul.msk.f32.vlgmr.msra.gmra.mxu0 %vm379_vm4, %v372_v17 }
 0x123   : > { %v431_v39 = vpop.permute.xlu1 %430 }
 0x199   : > { %v400_v19 = vpop.f32.mrf.mxu0 }
 0x19a   : > { %v401_v20 = vadd.f32 %v400_v19, %v377_v18 }
 0x19c   : > { %v403_v21 = vmax.f32 %v401_v20, 0.0 }
 0x19e   : > { %405 = vrot.lane.b32.xlu2 %v403_v21, %s874_s20  ;;  %s616_s20 = sshll.u32 %s861_s27, 3 }
 0x19f   : > { %s503_s22 = scalar_lea.hbm %s1080_s7, %s616_s20  ;;  %s803_s20 = scalar_lea.hbm %s1080_s7, 16 }
 0x1a0   : > { %s507_s30 = sshll.u32 %s503_s22, 4  ;;  %s508_s30 = int_to_ptr.hbm [resolvable:$true] %s507_s30 }
 0x1a1   : > { %s797_s27 = sshra.s32 %s508_s30, 4  ;;  %s798_s27 = int_to_ptr.hbm [resolvable:$true] %s797_s27 }
 0x1a2   : > { %s799_s12 = scalar_lea.hbm %s798_s27, 8  ;;  %p804_p5 = scmp.lt.s32.totalorder %s798_s27, %s1080_s7 }
 0x1a3   : > { %p800_p1 = scmp.ne.s32.totalorder %s798_s27, %s799_s12  ;;  %p805_p6 = scmp.lt.s32.totalorder %s803_s20, %s799_s12 }
 0x1a5   : > { %p801_p2 = pnand %p800_p1, %p958_p4  ;;  %p806_p7 = por %p805_p6, %p804_p5 }
 0x1a7   : > { %p802_p3 = pneg %p801_p2 }
 0x1a9   : > { %p807_p9 = pnand %p806_p7, %p802_p3 }
 0x1f8   : > { %v406_v22 = vpop.permute.xlu2 %405 }
 0x1f9   : > { %408 = vst.msk [vmem:[#allocation3] sm:$0xff] %vm350_vm1, %v406_v22 }
 0x1fa   : > { %409 = vst.msk [vmem:[#allocation3 + $0x8] sm:$0xff] %vm334_vm0, %v406_v22 }
 0x200   : > { %v410_v23 = vld [vmem:[#allocation3] sm:$0xff] }
 0x201   : > { %v411_v24 = vld [vmem:[#allocation3 + $0x8] sm:$0xff] }
 0x202   : > { %v716_v25 = vpack.i.bf16 %v411_v24, %v410_v23 }
 0x204   : > { %717 = vrot.lane.b32.xlu0 %v716_v25, %s875_s16  ;;  %712 = vrot.lane.b32.xlu2 %v716_v25, %s876_s21 }
 0x20c   : > { %461 = vperm.xlu2 %721, %v458_v27  }
 0x25e   : > { %v713_v28 = vpop.permute.xlu2 %712 }
 0x25f   : > { %v715_v29 = vunpack.i.h.bf16 %v713_v28  ;;  %v714_v30 = vunpack.i.l.bf16 %v713_v28 }
 0x261   : > { %v424_v31 = vsel %vm369_vm2, %v714_v30, %v715_v29 }
 0x262   : > { %449 = vmatpush.msra.mxu1 %v424_v31 }
 0x266   : > { %v462_v37 = vpop.permute.xlu2 %461 }
 0x267   : > { %v486_v42 = vadd.f32 %v485_v38, %v462_v37 }
 0x276   : > { %v718_v32 = vpop.permute.xlu0 %717 }
 0x277   : > { %v720_v33 = vunpack.i.h.bf16 %v718_v32  ;;  %v719_v34 = vunpack.i.l.bf16 %v718_v32 }
 0x279   : > { %v418_v35 = vsel %vm362_vm3, %v719_v34, %v720_v33 }
 0x27a   : > { %450 = vmatpush.msra.mxu1 %v418_v35 }
 0x27c   : > { %451 = vmatpush.msra.mxu1 %v410_v23 }
 0x27d   : > { %613 = vmatmul.msk.f32.vlgmr.msra.gmra.mxu1 %vm379_vm4, %v426_v36 }
 0x2fa   : > { %v453_v40 = vpop.f32.mrf.mxu1 }
 0x2fb   : > { %v454_v41 = vadd.f32 %v453_v40, %v431_v39 }
 0x2fd   : > { %v456_v43 = vmax.f32 %v454_v41, 0.0 }
 0x2ff   : > { %v488_v44 = vadd.f32 %v486_v42, %v456_v43 }
 0x301   : > { %v489_v45 = vmax.f32 %v488_v44, 0.0 }
 0x303   : > { %490 = vst [vmem:[%s321_s23] sm:$0xff] %v489_v45 }
 0x304   : > { %810 = shalt.err (!%p807_p9)
}
 0x305   : > { %627 = dma.vmem_to_hbm [thread:$0]  (%p958_p4), %s506_s8, 128, %s508_s30, %s492_s10  }
 0x306 PF: > { %p644_p10 = scmp.ge.s32.totalorder %s869_s29, 2  ;;  %s519_s18 = sand.u32 1, %s849_s24  }
 0x307   : > { %s520_s21 = scalar_lea.sflag [#allocation6], %s519_s18 }
 0x308   : > { %p637_p11 = pnand %p644_p10, %p965_p8 }
 0x30a   : > { %p638_p12 = pneg %p637_p11 }
 0x30c   : > { %844 = dma.done.wait (%p638_p12), %s520_s21, 128  }
 0x30d   : > { %846 = vsyncadd (%p638_p12), %s520_s21, 4294967168  ;;  %s22_s29 = sadd.s32 1, %s869_s29   ;;  %s1085_s24 = smov %s853_s25 }
 0x30e   : > { %p19_p13 = scmp.ge.s32.totalorder %s22_s29, 4   ;;  %s1086_s25 = smov %s857_s26 }
 0x30f   : > { %s1087_s26 = smov %s971_s14  ;;  %s1088_s27 = smov %s865_s28 }
 0x310   : > { %s1089_s28 = smov %s1091_s9  ;;  %21 = sbr.rel (!%p19_p13) target bundleno = 6 (0x6), region = 100 }
 0x315   :  { %526 = vsyncpa [#allocation5], 1 }
 0x316   :  { %528 = vsyncpa [#allocation5 + $0x1], 1 }
 0x317   :  { %529 = vsyncpa [#allocation8], 1 }
 0x318   :  { %530 = vsyncpa [#allocation6], 1 }
 0x319   :  { %532 = vsyncpa [#allocation6 + $0x1], 1 }

</bundles_post_ra>
